<compile_context>
chip_gen: v5e
topology: v5e:2x2
jax: 0.10.0
libtpu: 0.0.40
codegen_flags: <defaults>
</compile_context>

<pallas_src>
import math

import jax
import jax.numpy as jnp
from jax.experimental import pallas as pl
from jax.experimental.pallas import tpu as pltpu


def _round_up(x, m):
    return -(-x // m) * m


def _compute_gate(log_a, noise, *, temperature, low, high, hard, is_train):
    """O(U) gate computation in f32; matches ConcreteGate.get_gates forward value."""
    log_a = log_a.astype(jnp.float32)
    if is_train:
        noise = noise.astype(jnp.float32)
        logits = (jnp.log(noise) - jnp.log(1.0 - noise) + log_a) / temperature
    else:
        logits = log_a
    concrete = jax.nn.sigmoid(logits)
    clipped = jnp.clip(concrete * (high - low) + low, 0.0, 1.0)
    if hard:
        # Forward value only; straight-through backward is not implemented (see TODO above).
        clipped = (clipped > 0.5).astype(jnp.float32)
    return clipped


def _apply_gate_kernel(values_ref, gate_ref, out_ref):
    # (tile_m, tile_u) * (1, tile_u) broadcast multiply; dtypes already match,
    # so no extend/pack VPU work (bf16 values multiply in bf16 on v6e/v7x).
    out_ref[...] = values_ref[...] * gate_ref[...]


def _apply_gate_2d(values2d, gate_row, *, target_bytes=8 << 20,
                   vmem_limit_bytes=40 * 1024 * 1024):
    """out[m, u] = values2d[m, u] * gate_row[0, u] as a tiled HBM-streaming Pallas call."""
    m_eff, u_eff = values2d.shape
    itemsize = values2d.dtype.itemsize

    # --- lane-axis tiling only when a single 8-sublane slab would blow the VMEM budget.
    if 8 * u_eff * itemsize > target_bytes:
        tile_u = max(128, (target_bytes // (8 * itemsize)) // 128 * 128)
        tile_u = min(tile_u, u_eff)
    else:
        tile_u = u_eff
    n_u = pl.cdiv(u_eff, tile_u)

    # --- row-axis tiling: ~target_bytes per pipeline buffer, multiple of 8 sublanes.
    tile_m = max(8, (target_bytes // max(1, tile_u * itemsize)) // 8 * 8)
    if tile_m >= m_eff:
        if m_eff > 8 and n_u == 1:
            # Keep >= 2 row tiles so a v7x megacore can split the "parallel" grid.
            tile_m = _round_up(pl.cdiv(m_eff, 2), 8)
        else:
            tile_m = m_eff  # single full-extent block (exempt from 8-divisibility)
    else:
        n_m = pl.cdiv(m_eff, tile_m)
        if n_m > 1 and n_m % 2 == 1:
            # Prefer an even number of row tiles so the two v7x cores stay balanced.
            tile_m = max(8, _round_up(pl.cdiv(m_eff, n_m + 1), 8))
    n_m = pl.cdiv(m_eff, tile_m)

    val_spec = pl.BlockSpec((tile_m, tile_u), lambda i, j: (i, j))
    gate_spec = pl.BlockSpec((1, tile_u), lambda i, j: (0, j))

    return pl.pallas_call(
        _apply_gate_kernel,
        out_shape=jax.ShapeDtypeStruct((m_eff, u_eff), values2d.dtype),
        grid_spec=pltpu.PrefetchScalarGridSpec(
            num_scalar_prefetch=0,
            grid=(n_m, n_u),
            in_specs=[val_spec, gate_spec],
            out_specs=val_spec,
        ),
        compiler_params=pltpu.CompilerParams(
            dimension_semantics=("parallel", "parallel"),
            vmem_limit_bytes=vmem_limit_bytes,
        ),
    )(values2d, gate_row)


def concrete_gate_forward(values, log_a, noise=None, *,
                          temperature=0.33,
                          stretch_limits=(-0.1, 1.1),
                          hard=False,
                          is_train=True):
    """Applies the concrete gate to `values`.

    values: (B, L, U) float array
    log_a : (1, 1, U) float32 gate parameter
    noise : (1, 1, U) float32 uniform(eps, 1-eps) noise (required iff is_train)
    Returns (gated_values, reg) where reg is None (default penalties are 0).
    """
    low, high = stretch_limits
    B, L, U = values.shape
    M = B * L

    if is_train and noise is None:
        raise ValueError("noise is required when is_train=True")

    # Gate is computed once here (O(U) wrapper work, not the O(N) pre-scaling anti-pattern)
    # and cast to values.dtype so the kernel multiplies in the native streaming dtype.
    gate = _compute_gate(log_a.reshape(1, U),
                         None if noise is None else noise.reshape(1, U),
                         temperature=float(temperature),
                         low=float(low), high=float(high),
                         hard=bool(hard), is_train=bool(is_train))
    gate = gate.astype(values.dtype)                      # (1, U)

    # Lane-density fold factor: k consecutive rows folded into lanes -> last dim mult of 128.
    k = 128 // math.gcd(U, 128)
    values_flat = values.reshape(M, U)

    if k == 1:
        # U already a multiple of 128: stream as-is.
        out_flat = _apply_gate_2d(values_flat, gate)
    elif M % k == 0:
        # Clean fold: pure reshape (free), no pad / slice passes.
        gate_row = jnp.tile(gate, (1, k))                 # (1, U*k)
        out_flat = _apply_gate_2d(values_flat.reshape(M // k, U * k),
                                  gate_row).reshape(M, U)
    elif M > k:
        # Keep the bulk lane-dense; the <k leftover rows are a trivial XLA elementwise op.
        # (Costs one concat pass, but only on the rare non-divisible-M path.)
        main_rows = (M // k) * k
        gate_row = jnp.tile(gate, (1, k))
        out_main = _apply_gate_2d(
            values_flat[:main_rows].reshape(main_rows // k, U * k),
            gate_row).reshape(main_rows, U)
        tail = values_flat[main_rows:] * gate
        out_flat = jnp.concatenate([out_main, tail], axis=0)
    else:
        # Fewer rows than the fold factor: tiny input, run unfolded (masked stores are fine).
        out_flat = _apply_gate_2d(values_flat, gate)

    reg = None  # l0_penalty == l2_penalty == 0 by default
    return out_flat.reshape(B, L, U), reg


def _xavier_uniform(key, shape):
    """xavier_uniform_ for a Tensor(*shape) with shape = (1, 1, units)."""
    fan_out = shape[0]
    fan_in = shape[1]
    receptive = 1
    for d in shape[2:]:
        receptive *= d
    fan_in *= receptive
    fan_out *= receptive
    bound = (3.0 ** 0.5) * ((2.0 / (fan_in + fan_out)) ** 0.5)
    return jax.random.uniform(key, shape, jnp.float32, -bound, bound)


def _reference(values, log_a, noise, temperature, stretch_limits, hard, is_train):
    low, high = stretch_limits
    if is_train:
        concrete = jax.nn.sigmoid(
            (jnp.log(noise) - jnp.log(1.0 - noise) + log_a) / temperature)
    else:
        concrete = jax.nn.sigmoid(log_a)
    clipped = jnp.clip(concrete * (high - low) + low, 0.0, 1.0)
    if hard:
        clipped = (clipped > 0.5).astype(jnp.float32)
    return values * clipped


if __name__ == "__main__":
    key = jax.random.PRNGKey(0)
    k_vals, k_loga, k_noise, k_vals2 = jax.random.split(key, 4)

    B, L, U = 2, 8, 32
    eps = 1e-6
    temperature = 0.33
    stretch_limits = (-0.1, 1.1)

    values = jax.random.normal(k_vals, (B, L, U), jnp.float32)
    log_a = _xavier_uniform(k_loga, (1, 1, U))
    noise = jax.random.uniform(k_noise, (1, 1, U), jnp.float32,
                               minval=eps, maxval=1.0 - eps)

    # training-mode forward (with concrete noise)
    out_train, reg_train = concrete_gate_forward(
        values, log_a, noise,
        temperature=temperature, stretch_limits=stretch_limits,
        hard=False, is_train=True)
    out_train = jax.block_until_ready(out_train)

    # eval-mode forward (deterministic gate)
    out_eval, reg_eval = concrete_gate_forward(
        values, log_a, None,
        temperature=temperature, stretch_limits=stretch_limits,
        hard=False, is_train=False)
    out_eval = jax.block_until_ready(out_eval)

    # hard-gate forward (binarized gate value)
    out_hard, _ = concrete_gate_forward(
        values, log_a, noise,
        temperature=temperature, stretch_limits=stretch_limits,
        hard=True, is_train=True)
    out_hard = jax.block_until_ready(out_hard)

    # non-divisible M (exercises the lane-dense bulk + tiny XLA-tail path)
    B2, L2 = 3, 5
    values2 = jax.random.normal(k_vals2, (B2, L2, U), jnp.float32)
    out_rem, _ = concrete_gate_forward(
        values2, log_a, noise,
        temperature=temperature, stretch_limits=stretch_limits,
        hard=False, is_train=True)
    out_rem = jax.block_until_ready(out_rem)

    # sanity checks against a pure-JAX reference
    ref_train = _reference(values, log_a, noise, temperature, stretch_limits,
                           hard=False, is_train=True)
    ref_eval = _reference(values, log_a, noise, temperature, stretch_limits,
                          hard=False, is_train=False)
    ref_hard = _reference(values, log_a, noise, temperature, stretch_limits,
                          hard=True, is_train=True)
    ref_rem = _reference(values2, log_a, noise, temperature, stretch_limits,
                         hard=False, is_train=True)
    assert jnp.allclose(out_train, ref_train, atol=1e-5, rtol=1e-5)
    assert jnp.allclose(out_eval, ref_eval, atol=1e-5, rtol=1e-5)
    assert jnp.allclose(out_hard, ref_hard, atol=1e-5, rtol=1e-5)
    assert jnp.allclose(out_rem, ref_rem, atol=1e-5, rtol=1e-5)
    assert reg_train is None and reg_eval is None

    print("KERNEL_OK")
</pallas_src>

<mosaic_0001>
module attributes {stable_mosaic.version = 11 : i64} {
  func.func @_apply_gate_kernel(%arg0: i32, %arg1: i32, %arg2: memref<4x128xf32, #tpu.memory_space<vmem>>, %arg3: memref<1x128xf32, #tpu.memory_space<vmem>>, %arg4: memref<4x128xf32, #tpu.memory_space<vmem>>) attributes {dimension_semantics = [#tpu.dimension_semantics<parallel>, #tpu.dimension_semantics<parallel>], iteration_bounds = array<i64: 1, 1>, scalar_prefetch = 0 : i64, scratch_operands = 0 : i64, tpu.core_type = #tpu.core_type<tc>, window_params = [{transform_indices = @transform_0, window_bounds = array<i64: 4, 128>}, {transform_indices = @transform_1, window_bounds = array<i64: 1, 128>}, {transform_indices = @transform_2, window_bounds = array<i64: 4, 128>}]} {
    %c0 = arith.constant 0 : index
    %c0_0 = arith.constant 0 : index
    %0 = vector.load %arg2[%c0, %c0_0] : memref<4x128xf32, #tpu.memory_space<vmem>>, vector<4x128xf32>
    %c0_1 = arith.constant 0 : index
    %c0_2 = arith.constant 0 : index
    %1 = vector.load %arg3[%c0_1, %c0_2] : memref<1x128xf32, #tpu.memory_space<vmem>>, vector<1x128xf32>
    %2 = vector.broadcast %1 : vector<1x128xf32> to vector<4x128xf32>
    %3 = arith.mulf %0, %2 : vector<4x128xf32>
    %c0_3 = arith.constant 0 : index
    %c0_4 = arith.constant 0 : index
    %4 = vector.load %arg4[%c0_3, %c0_4] : memref<4x128xf32, #tpu.memory_space<vmem>>, vector<4x128xf32>
    tpu.vector_store %arg4[%c0_3, %c0_4], %3 {strides = array<i32>} : memref<4x128xf32, #tpu.memory_space<vmem>>, vector<4x128xf32>,
    return
  }
  func.func @transform_0(%arg0: i32, %arg1: i32) -> (i32, i32) {
    %c0_i32 = arith.constant 0 : i32
    return %arg0, %arg1 : i32, i32
  }
  func.func @transform_1(%arg0: i32, %arg1: i32) -> (i32, i32) {
    %c0_i32 = arith.constant 0 : i32
    %c0_i32_0 = arith.constant 0 : i32
    return %c0_i32, %arg1 : i32, i32
  }
  func.func @transform_2(%arg0: i32, %arg1: i32) -> (i32, i32) {
    %c0_i32 = arith.constant 0 : i32
    return %arg0, %arg1 : i32, i32
  }
}

</mosaic_0001>

<bundles_post_ra>
// kernel: tpu_custom_call.1
= control target key start
LH: loop header
LB: loop body
LE: loop exit
PB: predicated region body
PF: predicated region fallthrough
CT: control target
= control target key end

     0   :  { %7 = vsyncpa [#allocation3], 0  ;;  %s174_s0 = inlined_call_operand.hbm [shape: f32[4,128], index: 0, kind: input, shape index: {}]   ;;  %s175_s1 = inlined_call_operand.hbm [shape: f32[1,128], index: 1, kind: input, shape index: {}]   ;;  %s176_s2 = inlined_call_operand.hbm [shape: f32[4,128], index: 2, kind: output, shape index: {}]  }
   0x1   :  { %8 = vsyncpa [#allocation6], 0 }
   0x2   :  { %9 = vsyncpa [#allocation4], 0  ;;  %s15_s11 = sshll.u32 %s174_s0, 4  ;;  %s147_s12 = smov [#allocation2]   ;;  %s16_s11 = int_to_ptr.hbm [resolvable:$true] %s15_s11 }
   0x3   :  { %s17_s13 = sshll.u32 %s147_s12, 4  ;;  %s26_s16 = sshll.u32 %s175_s1, 4  ;;  %s18_s13 = int_to_ptr.vmem [resolvable:$true] %s17_s13  ;;  %s27_s16 = int_to_ptr.hbm [resolvable:$true] %s26_s16 }
   0x4   :  { %20 = dma.hbm_to_vmem [thread:$0]  %s16_s11, 64, %s18_s13, [#allocation3]  }
   0x5   :  { %s148_s17 = smov [#allocation5]  }
   0x6   :  { %s28_s18 = sshll.u32 %s148_s17, 4  ;;  %s29_s18 = int_to_ptr.vmem [resolvable:$true] %s28_s18 }
   0x7   :  { %31 = dma.hbm_to_vmem [thread:$0]  %s27_s16, 16, %s29_s18, [#allocation6]  }
   0x8   :  { %141 = dma.done.wait [#allocation3], 64  }
   0x9   :  { %142 = vsyncadd [#allocation3], 4294967232 }
   0xa   :  { %143 = dma.done.wait [#allocation6], 16  }
   0xb   :  { %144 = vsyncadd [#allocation6], 4294967280  ;;  %s149_s19 = smov [#allocation7]   ;;  %s54_s22 = sshll.u32 %s176_s2, 4  ;;  %v40_v0 = vld [vmem:[#allocation2] sm:$0xf]  ;;  %s55_s22 = int_to_ptr.hbm [resolvable:$true] %s54_s22 }
   0xc   :  { %s52_s0 = sshll.u32 %s149_s19, 4  ;;  %v68_v1 = vld [vmem:[#allocation5] ss:$0 sm:$0xff]  ;;  %s53_s0 = int_to_ptr.vmem [resolvable:$true] %s52_s0 }
   0xd   :  { %v45_v2 = vmul.f32 %v68_v1, %v40_v0 }
   0xf   :  { %46 = vst [vmem:[#allocation7] sm:$0xf] %v45_v2 }
  0x10   :  { %57 = dma.vmem_to_hbm [thread:$0]  %s53_s0, 64, %s55_s22, [#allocation4]  }
  0x11   :  { %145 = dma.done.wait [#allocation4], 64  }
  0x12   :  { %146 = vsyncadd [#allocation4], 4294967232 }
  0x13   :  { %62 = vsyncpa [#allocation3], 1 }
  0x14   :  { %63 = vsyncpa [#allocation6], 1 }
  0x15   :  { %64 = vsyncpa [#allocation4], 1 }

</bundles_post_ra>
